<compile_context>
chip_gen: v7x
topology: tpu7x:2x2x1
jax: 0.10.0
libtpu: 0.0.40
codegen_flags: <defaults>
</compile_context>

<pallas_src>
import functools
import math

import jax
import jax.numpy as jnp
from jax.experimental import pallas as pl
from jax.experimental.pallas import tpu as pltpu

BN_EPS = 1e-5
LANE = 128


def _round_up(n, m):
    return ((n + m - 1) // m) * m


def _fc_block_kernel(seed_ref, x_ref, w_ref, bgb_ref, o_ref, *, num_layers, drop_p):
    """All FCBlock layers fused: (Linear + ReLU + Dropout + BatchNorm1d) x num_layers."""
    B, D = x_ref.shape
    x = x_ref[...]                                        # (B, Dpad) f32, stays resident

    # --- dropout PRNG setup: counter-based hash over (seed, tile, layer, element) ---
    seed = seed_ref[0].astype(jnp.uint32)
    tile_salt = pl.program_id(0).astype(jnp.uint32)       # grid=(1,) today; safe if tiled later
    rows = jax.lax.broadcasted_iota(jnp.int32, (B, D), 0)
    cols = jax.lax.broadcasted_iota(jnp.int32, (B, D), 1)
    flat = (rows * D + cols).astype(jnp.uint32)
    keep_thresh = jnp.uint32(min(int(drop_p * 4294967296.0), 4294967295))
    keep_scale = jnp.float32(1.0 / (1.0 - drop_p)) if drop_p < 1.0 else jnp.float32(0.0)

    for l in range(num_layers):                           # static unroll (few layers)
        w = w_ref[l]                                      # (Dpad, Dpad), already (in, out)
        bgb = bgb_ref[l]                                  # (8, Dpad): 0=bias, 1=gamma, 2=beta
        b = bgb[0:1, :]
        gamma = bgb[1:2, :]
        beta = bgb[2:3, :]

        # ---- Linear (MXU, f32 accumulate) ----
        y = jnp.dot(x, w, preferred_element_type=jnp.float32) + b

        # ---- ReLU ----
        y = jnp.maximum(y, 0.0)

        # ---- Dropout (inverted), integer-threshold mask ----
        if drop_p > 0.0:
            key = (seed + tile_salt * jnp.uint32(0x85EBCA6B)
                   + jnp.uint32(l + 1)) * jnp.uint32(0x9E3779B1)
            h = flat ^ key
            h = h ^ (h >> 16)
            h = h * jnp.uint32(0x7FEB352D)
            h = h ^ (h >> 15)
            h = h * jnp.uint32(0x846CA68B)
            h = h ^ (h >> 16)
            y = jnp.where(h >= keep_thresh, y * keep_scale, 0.0)

        # ---- BatchNorm1d (training: batch mean, biased variance) ----
        mean = jnp.mean(y, axis=0, keepdims=True)
        var = jnp.mean(jnp.square(y - mean), axis=0, keepdims=True)
        x = (y - mean) * jax.lax.rsqrt(var + BN_EPS) * gamma + beta

    o_ref[...] = x


def init_fc_block_params(key, layer_dim_list):
    """Pre-transposed, pre-padded, stacked parameters (done ONCE, not per forward)."""
    if len(layer_dim_list) < 2:
        raise ValueError("len(layer_dim_list) must be >= 2")
    num_layers = len(layer_dim_list) - 1
    d_pad = _round_up(max(layer_dim_list), LANE)

    w_stacked = jnp.zeros((num_layers, d_pad, d_pad), jnp.float32)
    bgb_stacked = jnp.zeros((num_layers, 8, d_pad), jnp.float32)

    for i, (in_dim, out_dim) in enumerate(zip(layer_dim_list[:-1], layer_dim_list[1:])):
        key, kw, kb = jax.random.split(key, 3)
        bound = 1.0 / math.sqrt(in_dim)
        w = jax.random.uniform(kw, (out_dim, in_dim), jnp.float32, -bound, bound)
        b = jax.random.uniform(kb, (out_dim,), jnp.float32, -bound, bound)
        w_stacked = w_stacked.at[i, :in_dim, :out_dim].set(w.T)    # store (in, out)
        bgb_stacked = bgb_stacked.at[i, 0, :out_dim].set(b)        # bias
        bgb_stacked = bgb_stacked.at[i, 1, :out_dim].set(1.0)      # gamma (BN weight)
        # beta (BN bias) row 2 stays 0; padded feature columns stay exactly 0 everywhere.
    return w_stacked, bgb_stacked, d_pad


def fc_block_forward(x, w_stacked, bgb_stacked, layer_dim_list, drop_p=0.2, seed=0):
    """Single fused pallas_call for the whole FCBlock forward (training-mode)."""
    B, in_dim = x.shape
    num_layers, d_pad, _ = w_stacked.shape
    out_dim = layer_dim_list[-1]

    x_pad = jnp.zeros((B, d_pad), jnp.float32).at[:, :in_dim].set(x)
    seed_arr = jnp.array([seed], dtype=jnp.int32)

    grid_spec = pltpu.PrefetchScalarGridSpec(
        num_scalar_prefetch=1,               # dropout seed lives in SMEM
        grid=(1,),
        in_specs=[
            pl.BlockSpec((B, d_pad), lambda i, s: (0, 0)),                    # x (padded)
            pl.BlockSpec((num_layers, d_pad, d_pad), lambda i, s: (0, 0, 0)),  # stacked W^T
            pl.BlockSpec((num_layers, 8, d_pad), lambda i, s: (0, 0, 0)),      # bias/gamma/beta
        ],
        out_specs=pl.BlockSpec((B, d_pad), lambda i, s: (0, 0)),
    )

    out_pad = pl.pallas_call(
        functools.partial(_fc_block_kernel, num_layers=num_layers, drop_p=drop_p),
        out_shape=jax.ShapeDtypeStruct((B, d_pad), jnp.float32),
        grid_spec=grid_spec,
        compiler_params=pltpu.CompilerParams(
            dimension_semantics=("arbitrary",),
        ),
    )(seed_arr, x_pad, w_stacked, bgb_stacked)

    return out_pad[:, :out_dim]


if __name__ == "__main__":
    key = jax.random.PRNGKey(0)
    k_params, k_x = jax.random.split(key)

    layer_dim_list = [32, 64, 16]            # two (Linear -> ReLU -> Dropout -> BN) layers
    batch = 8
    drop_p = 0.2

    w_stacked, bgb_stacked, _ = init_fc_block_params(k_params, layer_dim_list)
    x = jax.random.normal(k_x, (batch, layer_dim_list[0]), jnp.float32)

    out = fc_block_forward(x, w_stacked, bgb_stacked, layer_dim_list,
                           drop_p=drop_p, seed=1234)
    out = jax.block_until_ready(out)

    assert out.shape == (batch, layer_dim_list[-1])
    assert out.dtype == jnp.float32
    assert bool(jnp.all(jnp.isfinite(out)))
    print("KERNEL_OK")
</pallas_src>

<mosaic_0001>
module attributes {stable_mosaic.version = 11 : i64} {
  func.func @_fc_block_kernel(%arg0: i32, %arg1: memref<1xi32, #tpu.memory_space<smem>>, %arg2: memref<8x128xf32, #tpu.memory_space<vmem>>, %arg3: memref<2x128x128xf32, #tpu.memory_space<vmem>>, %arg4: memref<2x8x128xf32, #tpu.memory_space<vmem>>, %arg5: memref<8x128xf32, #tpu.memory_space<vmem>>) attributes {dimension_semantics = [#tpu.dimension_semantics<arbitrary>], iteration_bounds = array<i64: 1>, scalar_prefetch = 1 : i64, scratch_operands = 0 : i64, tpu.core_type = #tpu.core_type<tc>, window_params = [{pipeline_mode = #tpu.pipeline_mode<synchronous>, transform_indices = @transform_0, window_bounds = array<i64: 8, 128>}, {pipeline_mode = #tpu.pipeline_mode<synchronous>, transform_indices = @transform_1, window_bounds = array<i64: 2, 128, 128>}, {pipeline_mode = #tpu.pipeline_mode<synchronous>, transform_indices = @transform_2, window_bounds = array<i64: 2, 8, 128>}, {pipeline_mode = #tpu.pipeline_mode<synchronous>, transform_indices = @transform_3, window_bounds = array<i64: 8, 128>}]} {
    %c0 = arith.constant 0 : index
    %c0_0 = arith.constant 0 : index
    %0 = vector.load %arg2[%c0, %c0_0] : memref<8x128xf32, #tpu.memory_space<vmem>>, vector<8x128xf32>
    %c0_1 = arith.constant 0 : index
    %1 = memref.load %arg1[%c0_1] : memref<1xi32, #tpu.memory_space<smem>>
    %2 = tpu.iota {dimensions = array<i32: 0>} : vector<8x128xi32>
    %3 = tpu.iota {dimensions = array<i32: 1>} : vector<8x128xi32>
    %c128_i32 = arith.constant 128 : i32
    %4 = vector.broadcast %c128_i32 : i32 to vector<8x128xi32>
    %5 = arith.muli %2, %4 : vector<8x128xi32>
    %6 = arith.addi %5, %3 : vector<8x128xi32>
    %c0_2 = arith.constant 0 : index
    %c0_3 = arith.constant 0 : index
    %c0_4 = arith.constant 0 : index
    %7 = vector.load %arg3[%c0_2, %c0_3, %c0_4] : memref<2x128x128xf32, #tpu.memory_space<vmem>>, vector<1x128x128xf32>
    %8 = vector.shape_cast %7 : vector<1x128x128xf32> to vector<128x128xf32>
    %c0_5 = arith.constant 0 : index
    %c0_6 = arith.constant 0 : index
    %c0_7 = arith.constant 0 : index
    %9 = vector.load %arg4[%c0_5, %c0_6, %c0_7] : memref<2x8x128xf32, #tpu.memory_space<vmem>>, vector<1x8x128xf32>
    %10 = vector.shape_cast %9 : vector<1x8x128xf32> to vector<8x128xf32>
    %11 = vector.extract_strided_slice %10 {offsets = [0, 0], sizes = [1, 128], strides = [1, 1]} : vector<8x128xf32> to vector<1x128xf32>
    %12 = vector.extract_strided_slice %10 {offsets = [1, 0], sizes = [1, 128], strides = [1, 1]} : vector<8x128xf32> to vector<1x128xf32>
    %13 = vector.extract_strided_slice %10 {offsets = [2, 0], sizes = [1, 128], strides = [1, 1]} : vector<8x128xf32> to vector<1x128xf32>
    %cst = arith.constant dense<0.000000e+00> : vector<8x128xf32>
    %14 = tpu.matmul %0, %8, %cst {dimension_numbers = #tpu.dot_dimension_numbers<[1], [0], [0], [1], [0, 0, 1, 1], [], []>} : vector<8x128xf32>, vector<128x128xf32>, vector<8x128xf32> -> vector<8x128xf32>
    %15 = vector.broadcast %11 : vector<1x128xf32> to vector<8x128xf32>
    %16 = arith.addf %14, %15 : vector<8x128xf32>
    %cst_8 = arith.constant 0.000000e+00 : f32
    %17 = vector.broadcast %cst_8 : f32 to vector<8x128xf32>
    %18 = arith.maximumf %16, %17 : vector<8x128xf32>
    %c-2048144789_i32 = arith.constant -2048144789 : i32
    %19 = arith.muli %arg0, %c-2048144789_i32 : i32
    %20 = arith.addi %1, %19 : i32
    %c1_i32 = arith.constant 1 : i32
    %21 = arith.addi %20, %c1_i32 : i32
    %c-1640531535_i32 = arith.constant -1640531535 : i32
    %22 = arith.muli %21, %c-1640531535_i32 : i32
    %23 = vector.broadcast %22 : i32 to vector<8x128xi32>
    %24 = arith.xori %6, %23 : vector<8x128xi32>
    %c16_i32 = arith.constant 16 : i32
    %25 = vector.broadcast %c16_i32 : i32 to vector<8x128xi32>
    %26 = arith.shrui %24, %25 : vector<8x128xi32>
    %27 = arith.xori %24, %26 : vector<8x128xi32>
    %c2146121005_i32 = arith.constant 2146121005 : i32
    %28 = vector.broadcast %c2146121005_i32 : i32 to vector<8x128xi32>
    %29 = arith.muli %27, %28 : vector<8x128xi32>
    %c15_i32 = arith.constant 15 : i32
    %30 = vector.broadcast %c15_i32 : i32 to vector<8x128xi32>
    %31 = arith.shrui %29, %30 : vector<8x128xi32>
    %32 = arith.xori %29, %31 : vector<8x128xi32>
    %c-2073254261_i32 = arith.constant -2073254261 : i32
    %33 = vector.broadcast %c-2073254261_i32 : i32 to vector<8x128xi32>
    %34 = arith.muli %32, %33 : vector<8x128xi32>
    %c16_i32_9 = arith.constant 16 : i32
    %35 = vector.broadcast %c16_i32_9 : i32 to vector<8x128xi32>
    %36 = arith.shrui %34, %35 : vector<8x128xi32>
    %37 = arith.xori %34, %36 : vector<8x128xi32>
    %c858993459_i32 = arith.constant 858993459 : i32
    %38 = vector.broadcast %c858993459_i32 : i32 to vector<8x128xi32>
    %39 = arith.cmpi uge, %37, %38 : vector<8x128xi32>
    %cst_10 = arith.constant 1.250000e+00 : f32
    %40 = vector.broadcast %cst_10 : f32 to vector<8x128xf32>
    %41 = arith.mulf %18, %40 : vector<8x128xf32>
    %cst_11 = arith.constant 0.000000e+00 : f32
    %42 = vector.broadcast %cst_11 : f32 to vector<8x128xf32>
    %43 = arith.select %39, %41, %42 : vector<8x128xi1>, vector<8x128xf32>
    %cst_12 = arith.constant dense<0.000000e+00> : vector<128xf32>
    %44 = vector.multi_reduction <add>, %43, %cst_12 [0] : vector<8x128xf32> to vector<128xf32>
    %45 = vector.shape_cast %44 : vector<128xf32> to vector<1x128xf32>
    %cst_13 = arith.constant 8.000000e+00 : f32
    %46 = vector.broadcast %cst_13 : f32 to vector<1x128xf32>
    %47 = arith.divf %45, %46 : vector<1x128xf32>
    %48 = vector.broadcast %47 : vector<1x128xf32> to vector<8x128xf32>
    %49 = arith.subf %43, %48 : vector<8x128xf32>
    %50 = arith.mulf %49, %49 : vector<8x128xf32>
    %cst_14 = arith.constant dense<0.000000e+00> : vector<128xf32>
    %51 = vector.multi_reduction <add>, %50, %cst_14 [0] : vector<8x128xf32> to vector<128xf32>
    %52 = vector.shape_cast %51 : vector<128xf32> to vector<1x128xf32>
    %cst_15 = arith.constant 8.000000e+00 : f32
    %53 = vector.broadcast %cst_15 : f32 to vector<1x128xf32>
    %54 = arith.divf %52, %53 : vector<1x128xf32>
    %55 = vector.broadcast %47 : vector<1x128xf32> to vector<8x128xf32>
    %56 = arith.subf %43, %55 : vector<8x128xf32>
    %cst_16 = arith.constant 9.99999974E-6 : f32
    %57 = vector.broadcast %cst_16 : f32 to vector<1x128xf32>
    %58 = arith.addf %54, %57 : vector<1x128xf32>
    %59 = math.rsqrt %58 : vector<1x128xf32>
    %60 = vector.broadcast %59 : vector<1x128xf32> to vector<8x128xf32>
    %61 = arith.mulf %56, %60 : vector<8x128xf32>
    %62 = vector.broadcast %12 : vector<1x128xf32> to vector<8x128xf32>
    %63 = arith.mulf %61, %62 : vector<8x128xf32>
    %64 = vector.broadcast %13 : vector<1x128xf32> to vector<8x128xf32>
    %65 = arith.addf %63, %64 : vector<8x128xf32>
    %c1 = arith.constant 1 : index
    %c0_17 = arith.constant 0 : index
    %c0_18 = arith.constant 0 : index
    %66 = vector.load %arg3[%c1, %c0_17, %c0_18] : memref<2x128x128xf32, #tpu.memory_space<vmem>>, vector<1x128x128xf32>
    %67 = vector.shape_cast %66 : vector<1x128x128xf32> to vector<128x128xf32>
    %c1_19 = arith.constant 1 : index
    %c0_20 = arith.constant 0 : index
    %c0_21 = arith.constant 0 : index
    %68 = vector.load %arg4[%c1_19, %c0_20, %c0_21] : memref<2x8x128xf32, #tpu.memory_space<vmem>>, vector<1x8x128xf32>
    %69 = vector.shape_cast %68 : vector<1x8x128xf32> to vector<8x128xf32>
    %70 = vector.extract_strided_slice %69 {offsets = [0, 0], sizes = [1, 128], strides = [1, 1]} : vector<8x128xf32> to vector<1x128xf32>
    %71 = vector.extract_strided_slice %69 {offsets = [1, 0], sizes = [1, 128], strides = [1, 1]} : vector<8x128xf32> to vector<1x128xf32>
    %72 = vector.extract_strided_slice %69 {offsets = [2, 0], sizes = [1, 128], strides = [1, 1]} : vector<8x128xf32> to vector<1x128xf32>
    %cst_22 = arith.constant dense<0.000000e+00> : vector<8x128xf32>
    %73 = tpu.matmul %65, %67, %cst_22 {dimension_numbers = #tpu.dot_dimension_numbers<[1], [0], [0], [1], [0, 0, 1, 1], [], []>} : vector<8x128xf32>, vector<128x128xf32>, vector<8x128xf32> -> vector<8x128xf32>
    %74 = vector.broadcast %70 : vector<1x128xf32> to vector<8x128xf32>
    %75 = arith.addf %73, %74 : vector<8x128xf32>
    %cst_23 = arith.constant 0.000000e+00 : f32
    %76 = vector.broadcast %cst_23 : f32 to vector<8x128xf32>
    %77 = arith.maximumf %75, %76 : vector<8x128xf32>
    %c-2048144789_i32_24 = arith.constant -2048144789 : i32
    %78 = arith.muli %arg0, %c-2048144789_i32_24 : i32
    %79 = arith.addi %1, %78 : i32
    %c2_i32 = arith.constant 2 : i32
    %80 = arith.addi %79, %c2_i32 : i32
    %c-1640531535_i32_25 = arith.constant -1640531535 : i32
    %81 = arith.muli %80, %c-1640531535_i32_25 : i32
    %82 = vector.broadcast %81 : i32 to vector<8x128xi32>
    %83 = arith.xori %6, %82 : vector<8x128xi32>
    %c16_i32_26 = arith.constant 16 : i32
    %84 = vector.broadcast %c16_i32_26 : i32 to vector<8x128xi32>
    %85 = arith.shrui %83, %84 : vector<8x128xi32>
    %86 = arith.xori %83, %85 : vector<8x128xi32>
    %c2146121005_i32_27 = arith.constant 2146121005 : i32
    %87 = vector.broadcast %c2146121005_i32_27 : i32 to vector<8x128xi32>
    %88 = arith.muli %86, %87 : vector<8x128xi32>
    %c15_i32_28 = arith.constant 15 : i32
    %89 = vector.broadcast %c15_i32_28 : i32 to vector<8x128xi32>
    %90 = arith.shrui %88, %89 : vector<8x128xi32>
    %91 = arith.xori %88, %90 : vector<8x128xi32>
    %c-2073254261_i32_29 = arith.constant -2073254261 : i32
    %92 = vector.broadcast %c-2073254261_i32_29 : i32 to vector<8x128xi32>
    %93 = arith.muli %91, %92 : vector<8x128xi32>
    %c16_i32_30 = arith.constant 16 : i32
    %94 = vector.broadcast %c16_i32_30 : i32 to vector<8x128xi32>
    %95 = arith.shrui %93, %94 : vector<8x128xi32>
    %96 = arith.xori %93, %95 : vector<8x128xi32>
    %c858993459_i32_31 = arith.constant 858993459 : i32
    %97 = vector.broadcast %c858993459_i32_31 : i32 to vector<8x128xi32>
    %98 = arith.cmpi uge, %96, %97 : vector<8x128xi32>
    %cst_32 = arith.constant 1.250000e+00 : f32
    %99 = vector.broadcast %cst_32 : f32 to vector<8x128xf32>
    %100 = arith.mulf %77, %99 : vector<8x128xf32>
    %cst_33 = arith.constant 0.000000e+00 : f32
    %101 = vector.broadcast %cst_33 : f32 to vector<8x128xf32>
    %102 = arith.select %98, %100, %101 : vector<8x128xi1>, vector<8x128xf32>
    %cst_34 = arith.constant dense<0.000000e+00> : vector<128xf32>
    %103 = vector.multi_reduction <add>, %102, %cst_34 [0] : vector<8x128xf32> to vector<128xf32>
    %104 = vector.shape_cast %103 : vector<128xf32> to vector<1x128xf32>
    %cst_35 = arith.constant 8.000000e+00 : f32
    %105 = vector.broadcast %cst_35 : f32 to vector<1x128xf32>
    %106 = arith.divf %104, %105 : vector<1x128xf32>
    %107 = vector.broadcast %106 : vector<1x128xf32> to vector<8x128xf32>
    %108 = arith.subf %102, %107 : vector<8x128xf32>
    %109 = arith.mulf %108, %108 : vector<8x128xf32>
    %cst_36 = arith.constant dense<0.000000e+00> : vector<128xf32>
    %110 = vector.multi_reduction <add>, %109, %cst_36 [0] : vector<8x128xf32> to vector<128xf32>
    %111 = vector.shape_cast %110 : vector<128xf32> to vector<1x128xf32>
    %cst_37 = arith.constant 8.000000e+00 : f32
    %112 = vector.broadcast %cst_37 : f32 to vector<1x128xf32>
    %113 = arith.divf %111, %112 : vector<1x128xf32>
    %114 = vector.broadcast %106 : vector<1x128xf32> to vector<8x128xf32>
    %115 = arith.subf %102, %114 : vector<8x128xf32>
    %cst_38 = arith.constant 9.99999974E-6 : f32
    %116 = vector.broadcast %cst_38 : f32 to vector<1x128xf32>
    %117 = arith.addf %113, %116 : vector<1x128xf32>
    %118 = math.rsqrt %117 : vector<1x128xf32>
    %119 = vector.broadcast %118 : vector<1x128xf32> to vector<8x128xf32>
    %120 = arith.mulf %115, %119 : vector<8x128xf32>
    %121 = vector.broadcast %71 : vector<1x128xf32> to vector<8x128xf32>
    %122 = arith.mulf %120, %121 : vector<8x128xf32>
    %123 = vector.broadcast %72 : vector<1x128xf32> to vector<8x128xf32>
    %124 = arith.addf %122, %123 : vector<8x128xf32>
    %c0_39 = arith.constant 0 : index
    %c0_40 = arith.constant 0 : index
    %125 = vector.load %arg5[%c0_39, %c0_40] : memref<8x128xf32, #tpu.memory_space<vmem>>, vector<8x128xf32>
    tpu.vector_store %arg5[%c0_39, %c0_40], %124 {strides = array<i32>} : memref<8x128xf32, #tpu.memory_space<vmem>>, vector<8x128xf32>,
    return
  }
  func.func @transform_0(%arg0: i32, %arg1: memref<1xi32, #tpu.memory_space<smem>>) -> (i32, i32) {
    %c0_i32 = arith.constant 0 : i32
    %c0_i32_0 = arith.constant 0 : i32
    %c0_i32_1 = arith.constant 0 : i32
    return %c0_i32, %c0_i32_0 : i32, i32
  }
  func.func @transform_1(%arg0: i32, %arg1: memref<1xi32, #tpu.memory_space<smem>>) -> (i32, i32, i32) {
    %c0_i32 = arith.constant 0 : i32
    %c0_i32_0 = arith.constant 0 : i32
    %c0_i32_1 = arith.constant 0 : i32
    %c0_i32_2 = arith.constant 0 : i32
    return %c0_i32, %c0_i32_0, %c0_i32_1 : i32, i32, i32
  }
  func.func @transform_2(%arg0: i32, %arg1: memref<1xi32, #tpu.memory_space<smem>>) -> (i32, i32, i32) {
    %c0_i32 = arith.constant 0 : i32
    %c0_i32_0 = arith.constant 0 : i32
    %c0_i32_1 = arith.constant 0 : i32
    %c0_i32_2 = arith.constant 0 : i32
    return %c0_i32, %c0_i32_0, %c0_i32_1 : i32, i32, i32
  }
  func.func @transform_3(%arg0: i32, %arg1: memref<1xi32, #tpu.memory_space<smem>>) -> (i32, i32) {
    %c0_i32 = arith.constant 0 : i32
    %c0_i32_0 = arith.constant 0 : i32
    %c0_i32_1 = arith.constant 0 : i32
    return %c0_i32, %c0_i32_0 : i32, i32
  }
}

</mosaic_0001>

<bundles_post_ra>
// kernel: tpu_custom_call.1
= control target key start
LH: loop header
LB: loop body
LE: loop exit
PB: predicated region body
PF: predicated region fallthrough
CT: control target
= control target key end

     0   :  { %10 = vsyncpa [#allocation5], 0  ;;  %s733_s0 = inlined_call_operand.<no memory space> [shape: s32[1], index: 0, kind: input, shape index: {}]   ;;  %s734_s1 = inlined_call_operand.hbm [shape: f32[8,128], index: 1, kind: input, shape index: {}]   ;;  %s735_s2 = inlined_call_operand.hbm [shape: f32[2,128,128], index: 2, kind: input, shape index: {}]   ;;  %s736_s3 = inlined_call_operand.hbm [shape: f32[2,8,128], index: 3, kind: input, shape index: {}]   ;;  %s737_s4 = inlined_call_operand.hbm [shape: f32[8,128], index: 4, kind: output, shape index: {}]  }
   0x1   :  { %11 = vsyncpa [#allocation8], 0 }
   0x2   :  { %12 = vsyncpa [#allocation6], 0  ;;  %s617_s15 = smov [#allocation7]   ;;  %s523_s19 = scalar_lea.hbm %s735_s2, 4096 }
   0x3   :  { %s28_s16 = sshll.u32 %s617_s15, 4  ;;  %p524_p0 = scmp.ne.s32.totalorder %s735_s2, %s523_s19  ;;  %s29_s16 = int_to_ptr.vmem [resolvable:$true] %s28_s16 }
   0x4   :  { %p527_p1 = scmp.lt.u32.totalorder %s523_s19, %s735_s2 }
   0x6   :  { %p529_p2 = pnand %p527_p1, %p524_p0 }
   0x8   :  { %532 = shalt.err (!%p529_p2)
}
   0x9   :  { %s533_s24 = scalar_lea.vmem %s29_s16, 4096  ;;  %p538_p4 = scmp.lt.s32.totalorder %s29_s16, %s29_s16 }
   0xa   :  { %p534_p3 = scmp.ne.s32.totalorder %s29_s16, %s533_s24  ;;  %p539_p5 = scmp.lt.s32.totalorder %s533_s24, %s533_s24 }
   0xc   :  { %p540_p6 = por %p539_p5, %p538_p4 }
   0xe   :  { %p541_p7 = pnand %p540_p6, %p534_p3 }
  0x10   :  { %544 = shalt.err (!%p541_p7)
}
  0x11   :  { %s618_s25 = smov 128   ;;  %s619_s26 = smov 8  }
  0x12   :  { %34 = dma.hbm_to_vmem [thread:$0]  %s735_s2, 4096, %s29_s16, [#allocation8], %s618_s25, %s618_s25, %s619_s26  }
  0x13   :  { %s620_s29 = smov [#allocation4]   ;;  %s621_s5 = smov [#allocation9]  }
  0x14   :  { %s19_s30 = sshll.u32 %s620_s29, 4  ;;  %s40_s6 = sshll.u32 %s621_s5, 4  ;;  %s20_s30 = int_to_ptr.vmem [resolvable:$true] %s19_s30  ;;  %s41_s6 = int_to_ptr.vmem [resolvable:$true] %s40_s6 }
  0x15   :  { %s545_s9 = scalar_lea.hbm %s734_s1, 128 }
  0x16   :  { %p546_p8 = scmp.ne.s32.totalorder %s734_s1, %s545_s9  ;;  %p549_p9 = scmp.lt.u32.totalorder %s545_s9, %s734_s1 }
  0x18   :  { %p551_p10 = pnand %p549_p9, %p546_p8 }
  0x1a   :  { %554 = shalt.err (!%p551_p10)
}
  0x1b   :  { %s555_s2 = scalar_lea.vmem %s20_s30, 128  ;;  %p560_p12 = scmp.lt.s32.totalorder %s20_s30, %s20_s30 }
  0x1c   :  { %p556_p11 = scmp.ne.s32.totalorder %s20_s30, %s555_s2  ;;  %p561_p13 = scmp.lt.s32.totalorder %s555_s2, %s555_s2 }
  0x1e   :  { %p562_p0 = por %p561_p13, %p560_p12 }
  0x20   :  { %p563_p1 = pnand %p562_p0, %p556_p11 }
  0x22   :  { %566 = shalt.err (!%p563_p1)
}
  0x23   :  { %22 = dma.hbm_to_vmem [thread:$0]  %s734_s1, 128, %s20_s30, [#allocation5]  }
  0x24   :  { %s567_s18 = scalar_lea.hbm %s736_s3, 256 }
  0x25   :  { %p568_p2 = scmp.ne.s32.totalorder %s736_s3, %s567_s18  ;;  %p571_p3 = scmp.lt.u32.totalorder %s567_s18, %s736_s3 }
  0x27   :  { %p573_p4 = pnand %p571_p3, %p568_p2 }
  0x29   :  { %576 = shalt.err (!%p573_p4)
}
  0x2a   :  { %s577_s23 = scalar_lea.vmem %s41_s6, 256  ;;  %p582_p6 = scmp.lt.s32.totalorder %s41_s6, %s41_s6 }
  0x2b   :  { %p578_p5 = scmp.ne.s32.totalorder %s41_s6, %s577_s23  ;;  %p583_p7 = scmp.lt.s32.totalorder %s577_s23, %s577_s23 }
  0x2d   :  { %p584_p8 = por %p583_p7, %p582_p6 }
  0x2f   :  { %p585_p9 = pnand %p584_p8, %p578_p5 }
  0x31   :  { %588 = shalt.err (!%p585_p9)
}
  0x32   :  { %46 = dma.hbm_to_vmem [thread:$0]  %s736_s3, 256, %s41_s6, [#allocation8], %s618_s25, %s618_s25, %s619_s26  }
  0x33   :  { %611 = dma.done.wait [#allocation5], 128  }
  0x34   :  { %612 = vsyncadd [#allocation5], 4294967168 }
  0x35   :  { %613 = dma.done.wait [#allocation8], 4352  }
  0x36   :  { %614 = vsyncadd [#allocation8], 4294962944  ;;  %v622_v0 = vmov 0.0|0.0   ;;  %vm623_vm0 = vmmov 0   ;;  %v624_v1 = vmov 0.0   ;;  %v64_v2 = vld [vmem:[#allocation7] sm:$0xff]  ;;  %v58_v51 = vlaneseq }
  0x37   :  { %462 = vmatprep.subr.bf16.mxu0 %v622_v0  ;;  %424 = vmatprep.mubr.msk.f32.mxu0 %vm623_vm0, %v624_v1  ;;  %v65_v3 = vld [vmem:[#allocation7 + $0x8] sm:$0xff]  ;;  %v66_v4 = vld [vmem:[#allocation7 + $0x10] sm:$0xff]  ;;  %v67_v6 = vld [vmem:[#allocation7 + $0x18] sm:$0xff]  ;;  %s158_s26 = sadd.s32 1, %s733_s0  ;;  %s297_s30 = sadd.s32 2, %s733_s0 }
  0x38   :  { %486 = vmatprep.subr.bf16.mxu1 %v622_v0  ;;  %459 = vmatprep.mubr.msk.f32.mxu1 %vm623_vm0, %v624_v1  ;;  %v463_v5 = vpack.c.bf16 %v65_v3, %v64_v2  ;;  %v466_v7 = vpack.c.bf16 %v67_v6, %v66_v4  ;;  %v68_v8 = vld [vmem:[#allocation7 + $0x20] sm:$0xff]  ;;  %v69_v9 = vld [vmem:[#allocation7 + $0x28] sm:$0xff]  ;;  %v70_v11 = vld [vmem:[#allocation7 + $0x30] sm:$0xff]  ;;  %v709_v52 = vshrl.u32 %v58_v51, 7  ;;  %v61_v53 = vand.u32 127, %v58_v51  ;;  %s625_s0 = smov [#allocation10]  }
  0x39   :  { %v469_v10 = vpack.c.bf16 %v69_v9, %v68_v8  ;;  %v71_v12 = vld [vmem:[#allocation7 + $0x38] sm:$0xff]  ;;  %v72_v14 = vld [vmem:[#allocation7 + $0x40] sm:$0xff]  ;;  %v73_v15 = vld [vmem:[#allocation7 + $0x48] sm:$0xff]  ;;  %s159_s27 = smul.u32 2654435761, %s158_s26  ;;  %s348_s6 = sshll.u32 %s625_s0, 4  ;;  %s349_s6 = int_to_ptr.vmem [resolvable:$true] %s348_s6 }
  0x3a   :  { %464 = vmatpush3.bf16.msra.mxu0 %v463_v5  ;;  %v472_v13 = vpack.c.bf16 %v71_v12, %v70_v11  ;;  %v475_v16 = vpack.c.bf16 %v73_v15, %v72_v14  ;;  %v74_v17 = vld [vmem:[#allocation7 + $0x50] sm:$0xff]  ;;  %v75_v18 = vld [vmem:[#allocation7 + $0x58] sm:$0xff]  ;;  %v76_v20 = vld [vmem:[#allocation7 + $0x60] sm:$0xff]  ;;  %v62_v54 = vmul.u32 128, %v709_v52  ;;  %s298_s5 = smul.u32 2654435761, %s297_s30  ;;  %p594_p11 = scmp.lt.s32.totalorder %s349_s6, %s349_s6 }
  0x3b   :  { %465 = vmatprep.subr.bf16.mxu0 %v622_v0  ;;  %v478_v19 = vpack.c.bf16 %v75_v18, %v74_v17  ;;  %v77_v21 = vld [vmem:[#allocation7 + $0x68] sm:$0xff]  ;;  %v78_v23 = vld [vmem:[#allocation7 + $0x70] sm:$0xff]  ;;  %v79_v24 = vld [vmem:[#allocation7 + $0x78] sm:$0xff]  ;;  %v160_v56 = vstv %s159_s27  ;;  %s589_s7 = scalar_lea.vmem %s349_s6, 128 }
  0x3c   :  { %v481_v22 = vpack.c.bf16 %v77_v21, %v76_v20  ;;  %v484_v25 = vpack.c.bf16 %v79_v24, %v78_v23  ;;  %v56_v26 = vld [vmem:[#allocation4] sm:$0xff]  ;;  %v204_v27 = vld [vmem:[#allocation7 + $0x80] sm:$0xff]  ;;  %v205_v28 = vld [vmem:[#allocation7 + $0x88] sm:$0xff]  ;;  %v63_v55 = vadd.s32 %v62_v54, %v61_v53  ;;  %p590_p10 = scmp.ne.s32.totalorder %s349_s6, %s589_s7  ;;  %p595_p12 = scmp.lt.s32.totalorder %s589_s7, %s589_s7 }
  0x3d   :  { %v487_v29 = vpack.c.bf16 %v205_v28, %v204_v27  ;;  %v206_v30 = vld [vmem:[#allocation7 + $0x90] sm:$0xff]  ;;  %v207_v31 = vld [vmem:[#allocation7 + $0x98] sm:$0xff]  ;;  %v208_v33 = vld [vmem:[#allocation7 + $0xa0] sm:$0xff]  ;;  %v195_v28 = vsub.s32 1, %v709_v52 }
  0x3e   :  { %467 = vmatpush3.bf16.msra.mxu0 %v466_v7  ;;  %v490_v32 = vpack.c.bf16 %v207_v31, %v206_v30  ;;  %v209_v34 = vld [vmem:[#allocation7 + $0xa8] sm:$0xff]  ;;  %v210_v36 = vld [vmem:[#allocation7 + $0xb0] sm:$0xff]  ;;  %v211_v37 = vld [vmem:[#allocation7 + $0xb8] sm:$0xff]  ;;  %v161_v57 = vxor.u32 %v160_v56, %v63_v55  ;;  %p596_p13 = por %p595_p12, %p594_p11 }
  0x3f   :  { %468 = vmatprep.subr.bf16.mxu0 %v622_v0  ;;  %488 = vmatpush3.bf16.msra.mxu1 %v487_v29  ;;  %v493_v35 = vpack.c.bf16 %v209_v34, %v208_v33  ;;  %v496_v38 = vpack.c.bf16 %v211_v37, %v210_v36  ;;  %v212_v39 = vld [vmem:[#allocation7 + $0xc0] sm:$0xff]  ;;  %v213_v40 = vld [vmem:[#allocation7 + $0xc8] sm:$0xff]  ;;  %v214_v42 = vld [vmem:[#allocation7 + $0xd0] sm:$0xff]  ;;  %v200_v29 = vsub.s32 2, %v709_v52  ;;  %v299_v36 = vstv %s298_s5 }
  0x40   :  { %489 = vmatprep.subr.bf16.mxu1 %v622_v0  ;;  %v499_v41 = vpack.c.bf16 %v213_v40, %v212_v39  ;;  %v215_v43 = vld [vmem:[#allocation7 + $0xd8] sm:$0xff]  ;;  %v216_v45 = vld [vmem:[#allocation7 + $0xe0] sm:$0xff]  ;;  %v217_v46 = vld [vmem:[#allocation7 + $0xe8] sm:$0xff]  ;;  %v162_v58 = vshrl.u32 %v161_v57, 16  ;;  %v300_v37 = vxor.u32 %v299_v36, %v63_v55  ;;  %p597_p0 = pnand %p596_p13, %p590_p10 }
  0x41   :  { %v502_v44 = vpack.c.bf16 %v215_v43, %v214_v42  ;;  %v505_v47 = vpack.c.bf16 %v217_v46, %v216_v45  ;;  %v218_v48 = vld [vmem:[#allocation7 + $0xf0] sm:$0xff]  ;;  %v219_v49 = vld [vmem:[#allocation7 + $0xf8] sm:$0xff]  ;;  %v80_v1 = vld [vmem:[#allocation9] sm:$0xff] }
  0x42   :  { %470 = vmatpush3.bf16.msra.mxu0 %v469_v10  ;;  %v508_v50 = vpack.c.bf16 %v219_v49, %v218_v48  ;;  %v163_v59 = vxor.u32 %v162_v58, %v161_v57  ;;  %v196_v30 = vrot.slane %v80_v1, %v195_v28  ;;  %v201_v33 = vrot.slane %v80_v1, %v200_v29 }
  0x43   :  { %471 = vmatprep.subr.bf16.mxu0 %v622_v0  ;;  %491 = vmatpush3.bf16.msra.mxu1 %v490_v32 }
  0x44   :  { %492 = vmatprep.subr.bf16.mxu1 %v622_v0  ;;  %v164_v60 = vmul.u32 2146121005, %v163_v59 }
  0x46   :  { %473 = vmatpush3.bf16.msra.mxu0 %v472_v13  ;;  %v165_v61 = vshrl.u32 %v164_v60, 15 }
  0x47   :  { %474 = vmatprep.subr.bf16.mxu0 %v622_v0  ;;  %494 = vmatpush3.bf16.msra.mxu1 %v493_v35 }
  0x48   :  { %495 = vmatprep.subr.bf16.mxu1 %v622_v0  ;;  %v166_v62 = vxor.u32 %v165_v61, %v164_v60 }
  0x4a   :  { %476 = vmatpush3.bf16.msra.mxu0 %v475_v16  ;;  %v167_v63 = vmul.u32 2221713035, %v166_v62 }
  0x4b   :  { %477 = vmatprep.subr.bf16.mxu0 %v622_v0  ;;  %497 = vmatpush3.bf16.msra.mxu1 %v496_v38  ;;  %v301_v38 = vshrl.u32 %v300_v37, 16 }
  0x4c   :  { %498 = vmatprep.subr.bf16.mxu1 %v622_v0  ;;  %v168_v2 = vshrl.u32 %v167_v63, 16 }
  0x4d   :  { %v302_v39 = vxor.u32 %v301_v38, %v300_v37 }
  0x4e   :  { %479 = vmatpush3.bf16.msra.mxu0 %v478_v19  ;;  %v169_v5 = vxor.u32 %v168_v2, %v167_v63 }
  0x4f   :  { %480 = vmatprep.subr.bf16.mxu0 %v622_v0  ;;  %500 = vmatpush3.bf16.msra.mxu1 %v499_v41  ;;  %v303_v40 = vmul.u32 2146121005, %v302_v39 }
  0x50   :  { %501 = vmatprep.subr.bf16.mxu1 %v622_v0  ;;  %vm170_vm1 = vcmp.ge.u32.totalorder %v169_v5, 858993459 }
  0x51   :  { %v304_v41 = vshrl.u32 %v303_v40, 15 }
  0x52   :  { %482 = vmatpush3.bf16.msra.mxu0 %v481_v22 }
  0x53   :  { %483 = vmatprep.subr.bf16.mxu0 %v622_v0  ;;  %503 = vmatpush3.bf16.msra.mxu1 %v502_v44  ;;  %v305_v42 = vxor.u32 %v304_v41, %v303_v40  ;;  %v221_v44 = vld [vmem:[#allocation9 + $0x8] sm:$0xff] }
  0x54   :  { %504 = vmatprep.subr.bf16.mxu1 %v622_v0 }
  0x55   :  { %v306_v43 = vmul.u32 2221713035, %v305_v42 }
  0x56   :  { %485 = vmatpush3.bf16.msra.mxu0 %v484_v25 }
  0x57   :  { %506 = vmatpush3.bf16.msra.mxu1 %v505_v47  ;;  %v307_v45 = vshrl.u32 %v306_v43, 16 }
  0x58   :  { %507 = vmatprep.subr.bf16.mxu1 %v622_v0  ;;  %v83_v0 = vsub.s32 0, %v709_v52 }
  0x59   :  { %425 = vmatmul.mubr.f32.vlgmr.msra.gmra.mrb[0].mxu0 %v56_v26  ;;  %v308_v48 = vxor.u32 %v307_v45, %v306_v43 }
  0x5a   :  { %v84_v3 = vrot.slane %v80_v1, %v83_v0  ;;  %v225_v46 = vrot.slane %v221_v44, %v83_v0 }
  0x5b   :  { %509 = vmatpush3.bf16.msra.mxu1 %v508_v50  ;;  %vm309_vm2 = vcmp.ge.u32.totalorder %v308_v48, 858993459 }
 0x12c   :  { %v151_v4 = vpop.f32.mrb[0].mxu0 }
 0x12d   :  { %v152_v6 = vadd.f32 %v151_v4, %v84_v3  ;;  %v426_v7 = vpop.f32.mrb[1].mxu0 }
 0x12e   :  { %v334_v7 = vrot.slane %v221_v44, %v195_v28 }
 0x12f   :  { %v155_v8 = vmax.f32 %v152_v6, 0.0 }
 0x131   :  { %v171_v9 = vmul.f32 1.25, %v155_v8 }
 0x133   :  { %v172_v10 = vsel %vm170_vm1, %v171_v9, 0.0 }
 0x134   :  { %v173_v11 = vrot.slane %v172_v10, 4 }
 0x136   :  { %v174_v12 = vadd.f32 %v173_v11, %v172_v10 }
 0x138   :  { %v175_v13 = vrot.slane %v174_v12, 2 }
 0x13a   :  { %v176_v14 = vadd.f32 %v175_v13, %v174_v12 }
 0x13c   :  { %v177_v15 = vrot.slane %v176_v14, 1 }
 0x13e   :  { %v178_v16 = vadd.f32 %v177_v15, %v176_v14 }
 0x140   :  { %v180_v17 = vmul.f32 0.125, %v178_v16 }
 0x142   :  { %v181_v18 = vsub.f32 %v172_v10, %v180_v17  ;;  %v339_v10 = vrot.slane %v221_v44, %v200_v29 }
 0x144   :  { %v182_v19 = vmul.f32 %v181_v18, %v181_v18 }
 0x146   :  { %v183_v20 = vrot.slane %v182_v19, 4 }
 0x148   :  { %v184_v21 = vadd.f32 %v183_v20, %v182_v19 }
 0x14a   :  { %v185_v22 = vrot.slane %v184_v21, 2 }
 0x14c   :  { %v186_v23 = vadd.f32 %v185_v22, %v184_v21 }
 0x14e   :  { %v187_v24 = vrot.slane %v186_v23, 1 }
 0x150   :  { %v188_v25 = vadd.f32 %v187_v24, %v186_v23 }
 0x152   :  { %v189_v26 = vmul.f32 0.125, %v188_v25 }
 0x154   :  { %v190_v27 = vadd.f32 1e-05, %v189_v26 }
 0x156   :  { %519 = vrsqrt.f32 %v190_v27 }
 0x160   :  { %v520_v31 = vpop.eup %519 }
 0x161   :  { %v192_v32 = vmul.f32 %v520_v31, %v181_v18 }
 0x163   :  { %v197_v34 = vmul.f32 %v196_v30, %v192_v32 }
 0x165   :  { %v202_v35 = vadd.f32 %v201_v33, %v197_v34 }
 0x167   :  { %460 = vmatmul.mubr.f32.vlgmr.msra.gmra.mrb[0].mxu1 %v202_v35 }
 0x23a   :  { %v292_v47 = vpop.f32.mrb[0].mxu1 }
 0x23b   :  { %v293_v49 = vadd.f32 %v292_v47, %v225_v46  ;;  %v461_v50 = vpop.f32.mrb[1].mxu1 }
 0x23d   :  { %v296_v51 = vmax.f32 %v293_v49, 0.0 }
 0x23f   :  { %v310_v52 = vmul.f32 1.25, %v296_v51 }
 0x241   :  { %v311_v53 = vsel %vm309_vm2, %v310_v52, 0.0 }
 0x242   :  { %v312_v54 = vrot.slane %v311_v53, 4 }
 0x244   :  { %v313_v56 = vadd.f32 %v312_v54, %v311_v53 }
 0x246   :  { %v314_v55 = vrot.slane %v313_v56, 2 }
 0x248   :  { %v315_v57 = vadd.f32 %v314_v55, %v313_v56 }
 0x24a   :  { %v316_v58 = vrot.slane %v315_v57, 1 }
 0x24c   :  { %v317_v59 = vadd.f32 %v316_v58, %v315_v57 }
 0x24e   :  { %v318_v60 = vmul.f32 0.125, %v317_v59 }
 0x250   :  { %v319_v61 = vsub.f32 %v311_v53, %v318_v60 }
 0x252   :  { %v320_v62 = vmul.f32 %v319_v61, %v319_v61 }
 0x254   :  { %v321_v63 = vrot.slane %v320_v62, 4 }
 0x256   :  { %v322_v1 = vadd.f32 %v321_v63, %v320_v62 }
 0x258   :  { %v323_v0 = vrot.slane %v322_v1, 2 }
 0x25a   :  { %v324_v2 = vadd.f32 %v323_v0, %v322_v1 }
 0x25c   :  { %v325_v3 = vrot.slane %v324_v2, 1 }
 0x25e   :  { %v326_v4 = vadd.f32 %v325_v3, %v324_v2 }
 0x260   :  { %v327_v5 = vmul.f32 0.125, %v326_v4 }
 0x262   :  { %v328_v6 = vadd.f32 1e-05, %v327_v5 }
 0x264   :  { %521 = vrsqrt.f32 %v328_v6 }
 0x26e   :  { %v522_v8 = vpop.eup %521 }
 0x26f   :  { %v330_v9 = vmul.f32 %v522_v8, %v319_v61 }
 0x271   :  { %v335_v11 = vmul.f32 %v334_v7, %v330_v9 }
 0x273   :  { %v340_v12 = vadd.f32 %v339_v10, %v335_v11 }
 0x275   :  { %341 = vst [vmem:[#allocation10] sm:$0xff] %v340_v12 }
 0x276   :  { %600 = shalt.err (!%p597_p0)
}
 0x277   :  { %s601_s10 = scalar_lea.hbm %s737_s4, 128 }
 0x278   :  { %p602_p1 = scmp.ne.s32.totalorder %s737_s4, %s601_s10  ;;  %p605_p2 = scmp.lt.u32.totalorder %s601_s10, %s737_s4 }
 0x27a   :  { %p607_p3 = pnand %p605_p2, %p602_p1 }
 0x27c   :  { %610 = shalt.err (!%p607_p3)
}
 0x27d   :  { %351 = dma.vmem_to_hbm [thread:$0]  %s349_s6, 128, %s737_s4, [#allocation6]  }
 0x27e   :  { %615 = dma.done.wait [#allocation6], 128  }
 0x27f   :  { %616 = vsyncadd [#allocation6], 4294967168 }
 0x280   :  { %355 = vsyncpa [#allocation5], 1 }
 0x281   :  { %356 = vsyncpa [#allocation8], 1 }
 0x282   :  { %357 = vsyncpa [#allocation6], 1 }

</bundles_post_ra>
